<compile_context>
chip_gen: v6e
topology: v6e:2x2x1
jax: 0.10.0
libtpu: 0.0.40
codegen_flags: <defaults>
</compile_context>

<pallas_src>
import jax
import jax.numpy as jnp
from jax.experimental import pallas as pl
from jax.experimental.pallas import tpu as pltpu


def _pick_hw_tile(hw_pad, max_lanes=1024):
    """Largest multiple of 128 that divides hw_pad and is <= max_lanes."""
    best = 128
    t = 128
    while t <= min(hw_pad, max_lanes):
        if hw_pad % t == 0:
            best = t
        t += 128
    return best


def scse_forward(x, w1, b1, w2, b2, ws, bs, *, max_tile_lanes=1024):
    """x: (N, C, H, W) float32. Returns (N, C, H, W)."""
    N, C, H, W = x.shape
    HW = H * W
    Cr = w1.shape[0]

    # lane-dense padding of the spatial axis (multiple of 128)
    HW_pad = ((HW + 127) // 128) * 128
    T = _pick_hw_tile(HW_pad, max_tile_lanes)
    n_t = HW_pad // T

    x_flat = x.reshape(N, C, HW)
    if HW_pad != HW:
        x_flat = jnp.pad(x_flat, ((0, 0), (0, 0), (0, HW_pad - HW)))

    b1_2d = b1.reshape(Cr, 1)
    b2_2d = b2.reshape(C, 1)
    bs_2d = bs.reshape(1, 1)

    inv_hw = 1.0 / float(HW)  # mean over the TRUE spatial size, not the padded one

    # ---------------- pass 1: cSE gate, (N, C, 1) ----------------
    def gate_kernel(x_ref, w1_ref, b1_ref, w2_ref, b2_ref, gate_ref, sum_ref):
        t = pl.program_id(1)

        @pl.when(t == 0)
        def _():
            sum_ref[...] = jnp.zeros_like(sum_ref)

        xt = x_ref[0].astype(jnp.float32)                      # (C, T)
        sum_ref[...] += jnp.sum(xt, axis=1, keepdims=True)     # (C, 1)

        @pl.when(t == pl.num_programs(1) - 1)
        def _():
            avg = sum_ref[...] * inv_hw                        # (C, 1)
            h = jnp.dot(w1_ref[...], avg,
                        preferred_element_type=jnp.float32) + b1_ref[...]   # (Cr, 1)
            h = jnp.maximum(h, 0.0)
            g = jax.nn.sigmoid(jnp.dot(w2_ref[...], h,
                                       preferred_element_type=jnp.float32)
                               + b2_ref[...])                  # (C, 1)
            gate_ref[0] = g

    gate = pl.pallas_call(
        gate_kernel,
        out_shape=jax.ShapeDtypeStruct((N, C, 1), jnp.float32),
        grid=(N, n_t),
        in_specs=[
            pl.BlockSpec((1, C, T), lambda n, t: (n, 0, t)),   # x tile
            pl.BlockSpec((Cr, C), lambda n, t: (0, 0)),        # w1 (C -> Cr)
            pl.BlockSpec((Cr, 1), lambda n, t: (0, 0)),        # b1
            pl.BlockSpec((C, Cr), lambda n, t: (0, 0)),        # w2 (Cr -> C)
            pl.BlockSpec((C, 1), lambda n, t: (0, 0)),         # b2
        ],
        out_specs=pl.BlockSpec((1, C, 1), lambda n, t: (n, 0, 0)),
        scratch_shapes=[pltpu.VMEM((C, 1), jnp.float32)],
        compiler_params=pltpu.CompilerParams(
            dimension_semantics=("parallel", "arbitrary")),
    )(x_flat, w1, b1_2d, w2, b2_2d)

    # ---------------- pass 2: sSE + fused apply, HW-tiled ----------------
    def apply_kernel(gate_ref, x_ref, ws_ref, bs_ref, o_ref):
        xt = x_ref[0].astype(jnp.float32)                      # (C, T)
        sse = jax.nn.sigmoid(
            jnp.dot(ws_ref[...], xt,
                    preferred_element_type=jnp.float32) + bs_ref[...])      # (1, T)
        cse = gate_ref[0]                                      # (C, 1)
        # fused combine: x*cse + x*sse == x*(cse + sse)  (one fewer full VPU mul)
        o_ref[0] = (xt * (cse + sse)).astype(o_ref.dtype)

    out_flat = pl.pallas_call(
        apply_kernel,
        out_shape=jax.ShapeDtypeStruct((N, C, HW_pad), x.dtype),
        grid=(N, n_t),
        in_specs=[
            pl.BlockSpec((1, C, 1), lambda n, t: (n, 0, 0)),   # cSE gate
            pl.BlockSpec((1, C, T), lambda n, t: (n, 0, t)),   # x tile
            pl.BlockSpec((1, C), lambda n, t: (0, 0)),         # ws (C -> 1)
            pl.BlockSpec((1, 1), lambda n, t: (0, 0)),         # bs
        ],
        out_specs=pl.BlockSpec((1, C, T), lambda n, t: (n, 0, t)),
        compiler_params=pltpu.CompilerParams(
            dimension_semantics=("parallel", "parallel")),
    )(gate, x_flat, ws, bs_2d)

    return out_flat[:, :, :HW].reshape(N, C, H, W)


def scse_reference(x, w1, b1, w2, b2, ws, bs):
    """Pure-JAX reference mirroring the PyTorch forward."""
    avg = jnp.mean(x, axis=(2, 3), keepdims=True)                         # (N,C,1,1)
    h = jnp.maximum(jnp.einsum('rc,ncij->nrij', w1, avg)
                    + b1[None, :, None, None], 0.0)                       # (N,Cr,1,1)
    cse = jax.nn.sigmoid(jnp.einsum('cr,nrij->ncij', w2, h)
                         + b2[None, :, None, None])                       # (N,C,1,1)
    sse = jax.nn.sigmoid(jnp.einsum('oc,nchw->nohw', ws, x)
                         + bs[None, :, None, None])                       # (N,1,H,W)
    return x * cse + x * sse


def init_params(key, in_channels, reduction=16):
    """Deterministic init matching the shapes of the PyTorch 1x1 convs."""
    cr = in_channels // reduction
    k1, k2, k3, k4, k5, k6 = jax.random.split(key, 6)

    def uinit(k, shape, fan_in):
        bound = 1.0 / jnp.sqrt(fan_in)
        return jax.random.uniform(k, shape, jnp.float32, -bound, bound)

    w1 = uinit(k1, (cr, in_channels), in_channels)   # Conv2d(C, C//r, 1).weight
    b1 = uinit(k2, (cr,), in_channels)
    w2 = uinit(k3, (in_channels, cr), cr)            # Conv2d(C//r, C, 1).weight
    b2 = uinit(k4, (in_channels,), cr)
    ws = uinit(k5, (1, in_channels), in_channels)    # Conv2d(C, 1, 1).weight
    bs = uinit(k6, (1,), in_channels)
    return w1, b1, w2, b2, ws, bs


if __name__ == "__main__":
    key = jax.random.PRNGKey(0)
    kx1, kx2, kp = jax.random.split(key, 3)

    C = 32                                   # reduction=16 -> hidden channels = 2
    w1, b1, w2, b2, ws, bs = init_params(kp, C, reduction=16)

    # Test 1: small shape; HW=64 -> padded to 128 (single lane-dense tile).
    N, H, W = 2, 8, 8
    x1 = jax.random.normal(kx1, (N, C, H, W), jnp.float32)
    out1 = jax.block_until_ready(scse_forward(x1, w1, b1, w2, b2, ws, bs))
    ref1 = scse_reference(x1, w1, b1, w2, b2, ws, bs)
    assert out1.shape == (N, C, H, W)
    assert jnp.allclose(out1, ref1, atol=1e-5, rtol=1e-5), (
        f"max abs diff {jnp.max(jnp.abs(out1 - ref1))}")

    # Test 2: HW=1600 -> padded to 1664 -> multiple 128-lane tiles; exercises
    # the accumulator pattern and the zero-padding / true-HW-mean path.
    N2, H2, W2 = 2, 40, 40
    x2 = jax.random.normal(kx2, (N2, C, H2, W2), jnp.float32)
    out2 = jax.block_until_ready(scse_forward(x2, w1, b1, w2, b2, ws, bs))
    ref2 = scse_reference(x2, w1, b1, w2, b2, ws, bs)
    assert out2.shape == (N2, C, H2, W2)
    assert jnp.allclose(out2, ref2, atol=1e-5, rtol=1e-5), (
        f"max abs diff {jnp.max(jnp.abs(out2 - ref2))}")

    print("KERNEL_OK")
</pallas_src>

<mosaic_0001>
module attributes {stable_mosaic.version = 11 : i64} {
  func.func @gate_kernel(%arg0: i32, %arg1: i32, %arg2: memref<1x32x128xf32, #tpu.memory_space<vmem>>, %arg3: memref<2x32xf32, #tpu.memory_space<vmem>>, %arg4: memref<2x1xf32, #tpu.memory_space<vmem>>, %arg5: memref<32x2xf32, #tpu.memory_space<vmem>>, %arg6: memref<32x1xf32, #tpu.memory_space<vmem>>, %arg7: memref<1x32x1xf32, #tpu.memory_space<vmem>>, %arg8: memref<32x1xf32, #tpu.memory_space<vmem>>) attributes {dimension_semantics = [#tpu.dimension_semantics<parallel>, #tpu.dimension_semantics<arbitrary>], iteration_bounds = array<i64: 2, 1>, scalar_prefetch = 0 : i64, scratch_operands = 1 : i64, tpu.core_type = #tpu.core_type<tc>, window_params = [{transform_indices = @transform_0, window_bounds = array<i64: 1, 32, 128>}, {pipeline_mode = #tpu.pipeline_mode<synchronous>, transform_indices = @transform_1, window_bounds = array<i64: 2, 32>}, {pipeline_mode = #tpu.pipeline_mode<synchronous>, transform_indices = @transform_2, window_bounds = array<i64: 2, 1>}, {pipeline_mode = #tpu.pipeline_mode<synchronous>, transform_indices = @transform_3, window_bounds = array<i64: 32, 2>}, {pipeline_mode = #tpu.pipeline_mode<synchronous>, transform_indices = @transform_4, window_bounds = array<i64: 32, 1>}, {transform_indices = @transform_5, window_bounds = array<i64: 1, 32, 1>}]} {
    %c0_i32 = arith.constant 0 : i32
    %0 = arith.cmpi eq, %arg1, %c0_i32 : i32
    %1 = arith.extui %0 : i1 to i32
    %c0_i32_0 = arith.constant 0 : i32
    %2 = arith.cmpi ne, %1, %c0_i32_0 : i32
    scf.if %2 {
      %cst_9 = arith.constant 0.000000e+00 : f32
      %13 = vector.broadcast %cst_9 : f32 to vector<32x1xf32>
      %c0_10 = arith.constant 0 : index
      %c0_11 = arith.constant 0 : index
      %14 = vector.load %arg8[%c0_10, %c0_11] : memref<32x1xf32, #tpu.memory_space<vmem>>, vector<32x1xf32>
      tpu.vector_store %arg8[%c0_10, %c0_11], %13 {strides = array<i32>} : memref<32x1xf32, #tpu.memory_space<vmem>>, vector<32x1xf32>,
    } else {
    }
    %c0 = arith.constant 0 : index
    %c0_1 = arith.constant 0 : index
    %c0_2 = arith.constant 0 : index
    %3 = vector.load %arg2[%c0, %c0_1, %c0_2] : memref<1x32x128xf32, #tpu.memory_space<vmem>>, vector<1x32x128xf32>
    %4 = vector.shape_cast %3 : vector<1x32x128xf32> to vector<32x128xf32>
    %c0_3 = arith.constant 0 : index
    %c0_4 = arith.constant 0 : index
    %5 = vector.load %arg8[%c0_3, %c0_4] : memref<32x1xf32, #tpu.memory_space<vmem>>, vector<32x1xf32>
    %cst = arith.constant dense<0.000000e+00> : vector<32xf32>
    %6 = vector.multi_reduction <add>, %4, %cst [1] : vector<32x128xf32> to vector<32xf32>
    %7 = vector.shape_cast %6 : vector<32xf32> to vector<32x1xf32>
    %8 = arith.addf %5, %7 : vector<32x1xf32>
    %c0_5 = arith.constant 0 : index
    %c0_6 = arith.constant 0 : index
    %9 = vector.load %arg8[%c0_5, %c0_6] : memref<32x1xf32, #tpu.memory_space<vmem>>, vector<32x1xf32>
    tpu.vector_store %arg8[%c0_5, %c0_6], %8 {strides = array<i32>} : memref<32x1xf32, #tpu.memory_space<vmem>>, vector<32x1xf32>,
    %c0_i32_7 = arith.constant 0 : i32
    %10 = arith.cmpi eq, %arg1, %c0_i32_7 : i32
    %11 = arith.extui %10 : i1 to i32
    %c0_i32_8 = arith.constant 0 : i32
    %12 = arith.cmpi ne, %11, %c0_i32_8 : i32
    scf.if %12 {
      %c0_9 = arith.constant 0 : index
      %c0_10 = arith.constant 0 : index
      %13 = vector.load %arg8[%c0_9, %c0_10] : memref<32x1xf32, #tpu.memory_space<vmem>>, vector<32x1xf32>
      %cst_11 = arith.constant 1.562500e-02 : f32
      %14 = vector.broadcast %cst_11 : f32 to vector<32x1xf32>
      %15 = arith.mulf %13, %14 : vector<32x1xf32>
      %c0_12 = arith.constant 0 : index
      %c0_13 = arith.constant 0 : index
      %16 = vector.load %arg3[%c0_12, %c0_13] : memref<2x32xf32, #tpu.memory_space<vmem>>, vector<2x32xf32>
      %cst_14 = arith.constant dense<0.000000e+00> : vector<2x1xf32>
      %17 = tpu.matmul %16, %15, %cst_14 {dimension_numbers = #tpu.dot_dimension_numbers<[1], [0], [0], [1], [0, 0, 1, 1], [], []>} : vector<2x32xf32>, vector<32x1xf32>, vector<2x1xf32> -> vector<2x1xf32>
      %c0_15 = arith.constant 0 : index
      %c0_16 = arith.constant 0 : index
      %18 = vector.load %arg4[%c0_15, %c0_16] : memref<2x1xf32, #tpu.memory_space<vmem>>, vector<2x1xf32>
      %19 = arith.addf %17, %18 : vector<2x1xf32>
      %cst_17 = arith.constant 0.000000e+00 : f32
      %20 = vector.broadcast %cst_17 : f32 to vector<2x1xf32>
      %21 = arith.maximumf %19, %20 : vector<2x1xf32>
      %c0_18 = arith.constant 0 : index
      %c0_19 = arith.constant 0 : index
      %22 = vector.load %arg5[%c0_18, %c0_19] : memref<32x2xf32, #tpu.memory_space<vmem>>, vector<32x2xf32>
      %cst_20 = arith.constant dense<0.000000e+00> : vector<32x1xf32>
      %23 = tpu.matmul %22, %21, %cst_20 {dimension_numbers = #tpu.dot_dimension_numbers<[1], [0], [0], [1], [0, 0, 1, 1], [], []>} : vector<32x2xf32>, vector<2x1xf32>, vector<32x1xf32> -> vector<32x1xf32>
      %c0_21 = arith.constant 0 : index
      %c0_22 = arith.constant 0 : index
      %24 = vector.load %arg6[%c0_21, %c0_22] : memref<32x1xf32, #tpu.memory_space<vmem>>, vector<32x1xf32>
      %25 = arith.addf %23, %24 : vector<32x1xf32>
      %26 = arith.negf %25 : vector<32x1xf32>
      %27 = math.exp %26 : vector<32x1xf32>
      %cst_23 = arith.constant 1.000000e+00 : f32
      %28 = vector.broadcast %cst_23 : f32 to vector<32x1xf32>
      %29 = arith.addf %28, %27 : vector<32x1xf32>
      %30 = arith.divf %28, %29 : vector<32x1xf32>
      %c0_24 = arith.constant 0 : index
      %c0_25 = arith.constant 0 : index
      %c0_26 = arith.constant 0 : index
      %31 = vector.load %arg7[%c0_24, %c0_25, %c0_26] : memref<1x32x1xf32, #tpu.memory_space<vmem>>, vector<1x32x1xf32>
      %32 = vector.shape_cast %31 : vector<1x32x1xf32> to vector<32x1xf32>
      %33 = vector.shape_cast %30 : vector<32x1xf32> to vector<1x32x1xf32>
      tpu.vector_store %arg7[%c0_24, %c0_25, %c0_26], %33 {strides = array<i32>} : memref<1x32x1xf32, #tpu.memory_space<vmem>>, vector<1x32x1xf32>,
    } else {
    }
    return
  }
  func.func @transform_0(%arg0: i32, %arg1: i32) -> (i32, i32, i32) {
    %c0_i32 = arith.constant 0 : i32
    %c0_i32_0 = arith.constant 0 : i32
    return %arg0, %c0_i32, %arg1 : i32, i32, i32
  }
  func.func @transform_1(%arg0: i32, %arg1: i32) -> (i32, i32) {
    %c0_i32 = arith.constant 0 : i32
    %c0_i32_0 = arith.constant 0 : i32
    %c0_i32_1 = arith.constant 0 : i32
    return %c0_i32, %c0_i32_0 : i32, i32
  }
  func.func @transform_2(%arg0: i32, %arg1: i32) -> (i32, i32) {
    %c0_i32 = arith.constant 0 : i32
    %c0_i32_0 = arith.constant 0 : i32
    %c0_i32_1 = arith.constant 0 : i32
    return %c0_i32, %c0_i32_0 : i32, i32
  }
  func.func @transform_3(%arg0: i32, %arg1: i32) -> (i32, i32) {
    %c0_i32 = arith.constant 0 : i32
    %c0_i32_0 = arith.constant 0 : i32
    %c0_i32_1 = arith.constant 0 : i32
    return %c0_i32, %c0_i32_0 : i32, i32
  }
  func.func @transform_4(%arg0: i32, %arg1: i32) -> (i32, i32) {
    %c0_i32 = arith.constant 0 : i32
    %c0_i32_0 = arith.constant 0 : i32
    %c0_i32_1 = arith.constant 0 : i32
    return %c0_i32, %c0_i32_0 : i32, i32
  }
  func.func @transform_5(%arg0: i32, %arg1: i32) -> (i32, i32, i32) {
    %c0_i32 = arith.constant 0 : i32
    %c0_i32_0 = arith.constant 0 : i32
    %c0_i32_1 = arith.constant 0 : i32
    return %arg0, %c0_i32, %c0_i32_0 : i32, i32, i32
  }
}

</mosaic_0001>

<bundles_post_ra>
// kernel: tpu_custom_call.1
= control target key start
LH: loop header
LB: loop body
LE: loop exit
PB: predicated region body
PF: predicated region fallthrough
CT: control target
= control target key end

     0   :  { %s727_s18 = smov 0   ;;  %s729_s19 = smov 0   ;;  %s809_s0 = inlined_call_operand.vmem [shape: f32[2,32,128], index: 0, kind: input, shape index: {}]   ;;  %s810_s1 = inlined_call_operand.vmem [shape: f32[2,32], index: 1, kind: input, shape index: {}]   ;;  %s811_s2 = inlined_call_operand.vmem [shape: f32[2,1], index: 2, kind: input, shape index: {}]   ;;  %s812_s3 = inlined_call_operand.vmem [shape: f32[32,2], index: 3, kind: input, shape index: {}]   ;;  %s813_s4 = inlined_call_operand.vmem [shape: f32[32,1], index: 4, kind: input, shape index: {}]   ;;  %s814_s5 = inlined_call_operand.vmem [shape: f32[2,32,1], index: 5, kind: output, shape index: {}]  }
   0x1   :  { %s731_s20 = smov 0  }
   0x2 LB: > { %s27_s21 = sadd.s32 1, %s689_s19  ;;  %p581_p0 = scmp.ge.s32.totalorder %s693_s20, 1  ;;  %s693_s20 = sphi %s731_s20, %s15_s20   ;;  %s689_s19 = sphi %s729_s19, %s816_s19   ;;  %s685_s18 = sphi %s727_s18, %s815_s18  }
   0x3   : > { %p29_p1 = scmp.ge.s32.totalorder %s27_s21, 2  ;;  %p204_p2 = scmp.lt.s32.totalorder %s693_s20, 3 }
   0x5   : > { %s818_s21 = smov (%p29_p1, %s27_s21), 0  ;;  %p205_p3 = pnand %p581_p0, %p204_p2 }
   0x6   : > { %p235_p4 = scmp.lt.s32.totalorder (!%p205_p3), %s685_s18, 1 }
   0x7   : > { %208 = sbr.rel (%p205_p3) target bundleno = 608 (0x260), region = 40 }
   0xc   : > { %vm252_vm0 = vcmask 7168   ;;  %v695_v0 = vmov 0.0   ;;  %s820_s18 = smov (!%p235_p4, %s685_s18), 1  ;;  %vm696_vm1 = vmmov 0   ;;  %v293_v25 = vld [vmem:[%s810_s1] sm:$0x3] }
   0xd   : > { %256 = vst.msk [vmem:[#allocation2 + $0x18] sm:$0xff] %vm252_vm0, %v695_v0  ;;  %253 = vst.msk [vmem:[#allocation2] sm:$0xff] %vm252_vm0, %v695_v0  ;;  %610 = vmatprep.subr.mxu0 %v695_v0  ;;  %s598_s22 = sshll.u32 %s820_s18, 5  ;;  %618 = vmatprep.mubr.msk.f32.mxu0 %vm696_vm1, %v695_v0  ;;  %vm295_vm2 = vcmask 261120   ;;  %v370_v26 = vld [vmem:[%s812_s3] sm:$0xff]  ;;  %vm378_vm3 = vcmask 15360  }
   0xe   : > { %254 = vst.msk [vmem:[#allocation2 + $0x8] sm:$0xff] %vm252_vm0, %v695_v0  ;;  %255 = vst.msk [vmem:[#allocation2 + $0x10] sm:$0xff] %vm252_vm0, %v695_v0  ;;  %s242_s25 = scalar_lea.vmem %s809_s0, %s598_s22  ;;  %623 = vmatprep.mubr.msk.f32.mxu1 %vm378_vm3, %v370_v26  ;;  %v294_v27 = vld [vmem:[%s811_s2] sm:$0x3]  ;;  %vm391_vm4 = vcmask 1041408   ;;  %v371_v32 = vld [vmem:[%s812_s3 + $0x8] sm:$0xff]  ;;  %s247_s28 = scalar_lea.vmem %s814_s5, %s598_s22 }
   0xf   : > { %v260_v1 = vld [vmem:[%s242_s25 + $0x18] sm:$0xff]  ;;  %v258_v2 = vld [vmem:[%s242_s25 + $0x8] sm:$0xff]  ;;  %v259_v3 = vld [vmem:[%s242_s25 + $0x10] sm:$0xff] }
  0x10   : > { %271 = vadd.xlane.f32.xlu0 %v260_v1  ;;  %267 = vadd.xlane.f32.xlu1 %v258_v2  ;;  %v257_v4 = vld [vmem:[%s242_s25] sm:$0xff]  ;;  %v372_v33 = vld [vmem:[%s812_s3 + $0x10] sm:$0xff]  ;;  %v373_v34 = vld [vmem:[%s812_s3 + $0x18] sm:$0xff] }
  0x11   : > { %v375_v35 = vld [vmem:[%s813_s4 + $0x8] sm:$0xff]  ;;  %v374_v37 = vld [vmem:[%s813_s4] sm:$0xff]  ;;  %v377_v40 = vld [vmem:[%s813_s4 + $0x18] sm:$0xff] }
  0x12   : > { %v376_v44 = vld [vmem:[%s813_s4 + $0x10] sm:$0xff] }
  0x14   : > { %269 = vadd.xlane.f32.xlu0 %v259_v3  ;;  %265 = vadd.xlane.f32.xlu1 %v257_v4  ;;  %v264_v5 = vld [vmem:[#allocation2 + $0x18] sm:$0xff]  ;;  %v261_v12 = vld [vmem:[#allocation2] sm:$0xff] }
  0x15   : > { %v262_v6 = vld [vmem:[#allocation2 + $0x8] sm:$0xff]  ;;  %v263_v11 = vld [vmem:[#allocation2 + $0x10] sm:$0xff] }
  0x99   : > { %v272_v7 = vpop.xlane.xlu0 %271  ;;  %v268_v8 = vpop.xlane.xlu1 %267 }
  0x9a   : > { %v276_v9 = vadd.f32 %v272_v7, %v264_v5  ;;  %v274_v10 = vadd.f32 %v268_v8, %v262_v6 }
  0x9c   : > { %281 = vst.msk [vmem:[#allocation2 + $0x18] sm:$0xff] %vm252_vm0, %v276_v9  ;;  %279 = vst.msk [vmem:[#allocation2 + $0x8] sm:$0xff] %vm252_vm0, %v274_v10 }
  0x9d   : > { %v270_v13 = vpop.xlane.xlu0 %269  ;;  %v266_v14 = vpop.xlane.xlu1 %265 }
  0x9e   : > { %v275_v15 = vadd.f32 %v270_v13, %v263_v11  ;;  %v273_v16 = vadd.f32 %v266_v14, %v261_v12 }
  0xa0   : > { %280 = vst.msk [vmem:[#allocation2 + $0x10] sm:$0xff] %vm252_vm0, %v275_v15  ;;  %278 = vst.msk [vmem:[#allocation2] sm:$0xff] %vm252_vm0, %v273_v16 }
  0xa3   : > { %v288_v17 = vld [vmem:[#allocation2 + $0x18] sm:$0xff]  ;;  %v286_v20 = vld [vmem:[#allocation2 + $0x8] sm:$0xff] }
  0xa4   : > { %v292_v18 = vmul.f32 0.015625, %v288_v17  ;;  %v290_v23 = vmul.f32 0.015625, %v286_v20 }
  0xa6   : > { %611 = vmatpush3.msra.mxu0 %v292_v18 }
  0xa7   : > { %612 = vmatprep.subr.mxu0 %v695_v0  ;;  %v287_v19 = vld [vmem:[#allocation2 + $0x10] sm:$0xff]  ;;  %v285_v21 = vld [vmem:[#allocation2] sm:$0xff] }
  0xa8   : > { %v291_v22 = vmul.f32 0.015625, %v287_v19  ;;  %v289_v24 = vmul.f32 0.015625, %v285_v21 }
  0xaa   : > { %613 = vmatpush3.msra.mxu0 %v291_v22 }
  0xab   : > { %614 = vmatprep.subr.mxu0 %v695_v0 }
  0xac   : > { %615 = vmatpush3.msra.mxu0 %v290_v23 }
  0xad   : > { %616 = vmatprep.subr.mxu0 %v695_v0 }
  0xae   : > { %617 = vmatpush3.msra.mxu0 %v289_v24 }
  0xaf   : > { %619 = vmatmul.mubr.msk.f32.vlgmr.msra.gmra.mxu0 %vm295_vm2, %v293_v25 }
 0x16f   : > { %v365_v28 = vpop.f32.mrf.mxu0 }
 0x170   : > { %v366_v29 = vadd.f32 %v365_v28, %v294_v27 }
 0x171   : > { %v620_v30 = vpop.f32.mrf.mxu0 }
 0x172   : > { %v369_v31 = vmax.f32 %v366_v29, 0.0 }
 0x174   : > { %621 = vmatprep.subr.msk.mxu1 %vm391_vm4, %v369_v31 }
 0x175   : > { %622 = vmatpush3.msk.msra.mxu1 %vm391_vm4, %v369_v31 }
 0x176   : > { %624 = vmatmul.mubr.msk.f32.vlgmr.msra.gmra.mxu1 %vm378_vm3, %v371_v32 }
 0x177   : > { %626 = vmatprep.mubr.msk.f32.mxu1 %vm378_vm3, %v372_v33 }
 0x17a   : > { %627 = vmatmul.mubr.msk.f32.gmra.mxu1 %vm378_vm3, %v373_v34 }
 0x236   : > { %v625_v36 = vpop.f32.mrf.mxu1 }
 0x237   : > { %v467_v38 = vadd.f32 %v625_v36, %v375_v35 }
 0x238   : > { %v461_v39 = vpop.f32.mrf.mxu1 }
 0x239   : > { %v593_v41 = vmul.f32 -1.442695, %v467_v38  ;;  %v462_v42 = vadd.f32 %v461_v39, %v374_v37 }
 0x23a   : > { %v628_v43 = vpop.f32.mrf.mxu1 }
 0x23b   : > { %655 = vpow2.f32 %v593_v41  ;;  %v592_v45 = vmul.f32 -1.442695, %v462_v42  ;;  %v477_v46 = vadd.f32 %v628_v43, %v377_v40 }
 0x23c   : > { %v471_v47 = vpop.f32.mrf.mxu1 }
 0x23d   : > { %657 = vpow2.f32 %v592_v45  ;;  %v595_v48 = vmul.f32 -1.442695, %v477_v46  ;;  %v472_v49 = vadd.f32 %v471_v47, %v376_v44 }
 0x23f   : > { %659 = vpow2.f32 %v595_v48  ;;  %v594_v50 = vmul.f32 -1.442695, %v472_v49 }
 0x241   : > { %661 = vpow2.f32 %v594_v50 }
 0x248   : > { %v656_v51 = vpop.eup %655 }
 0x249   : > { %v493_v52 = vadd.f32 1.0, %v656_v51 }
 0x24a   : > { %v658_v53 = vpop.eup %657 }
 0x24b   : > { %663 = vrcp.f32 %v493_v52  ;;  %v492_v54 = vadd.f32 1.0, %v658_v53 }
 0x24c   : > { %v660_v55 = vpop.eup %659 }
 0x24d   : > { %665 = vrcp.f32 %v492_v54  ;;  %v495_v56 = vadd.f32 1.0, %v660_v55 }
 0x24e   : > { %v662_v57 = vpop.eup %661 }
 0x24f   : > { %667 = vrcp.f32 %v495_v56  ;;  %v494_v58 = vadd.f32 1.0, %v662_v57 }
 0x251   : > { %669 = vrcp.f32 %v494_v58 }
 0x258   : > { %v664_v59 = vpop.eup %663 }
 0x259   : > { %505 = vst.msk [vmem:[%s247_s28 + $0x8] sm:$0xff] %vm252_vm0, %v664_v59 }
 0x25a   : > { %v666_v60 = vpop.eup %665 }
 0x25b   : > { %504 = vst.msk [vmem:[%s247_s28] sm:$0xff] %vm252_vm0, %v666_v60 }
 0x25c   : > { %v668_v61 = vpop.eup %667 }
 0x25d   : > { %507 = vst.msk [vmem:[%s247_s28 + $0x18] sm:$0xff] %vm252_vm0, %v668_v61 }
 0x25e   : > { %v670_v62 = vpop.eup %669 }
 0x25f   : > { %506 = vst.msk [vmem:[%s247_s28 + $0x10] sm:$0xff] %vm252_vm0, %v670_v62 }
 0x260 PF: > { %s15_s20 = sadd.s32 1, %s693_s20   ;;  %s815_s18 = smov %s689_s19 }
 0x261   : > { %p12_p5 = scmp.ge.s32.totalorder %s15_s20, 4   ;;  %s816_s19 = smov %s818_s21 }
 0x263   :  { %14 = sbr.rel (!%p12_p5) target bundleno = 2 (0x2), region = 78 }

</bundles_post_ra>
